<compile_context>
chip_gen: v7x
topology: tpu7x:2x2x1
jax: 0.10.0
libtpu: 0.0.40
codegen_flags: <defaults>
</compile_context>

<pallas_src>
import numpy as np
import jax
import jax.numpy as jnp
from jax.experimental import pallas as pl
from jax.experimental.pallas import tpu as pltpu


def _make_sinusoid_pe(max_len: int, emb_dim: int) -> jnp.ndarray:
    """Reproduce the numpy PE construction from the PyTorch __init__."""
    pos = np.expand_dims(np.arange(max_len), 1).astype(np.float64)
    pe = pos / np.power(10000, 2 * np.expand_dims(np.arange(emb_dim) // 2, 0) / emb_dim)
    pe[:, 0::2] = np.sin(pe[:, 0::2])
    pe[:, 1::2] = np.cos(pe[:, 1::2])
    return jnp.asarray(pe, dtype=jnp.float32)  # [max_len, emb_dim]


def _pick_seq_tile(seq_len: int, batch: int, cap: int = 256) -> int:
    """Largest 8-aligned sequence tile <= cap dividing seq_len (fallback: full)."""
    ts = seq_len
    for cand in (256, 128, 64, 32, 16, 8):
        if cand <= cap and seq_len % cand == 0:
            ts = cand
            break
    # v7x megacore: make sure the grid exposes >= 2 steps when we legally can
    # (halving keeps 8-alignment only when ts is a multiple of 16).
    while batch * (seq_len // ts) < 2 and ts % 16 == 0:
        ts //= 2
    return ts


def _make_kernel(seq_len: int, seq_tile: int):
    def kernel(ids_ref, emb_hbm, pe_ref, out_ref, gbuf, sem):
        # ids_ref : SMEM [B*S] int32        (scalar-prefetched token ids)
        # emb_hbm : HBM  [V, E] f32         (memory_space=pl.ANY, no auto-DMA)
        # pe_ref  : VMEM [TS, E] f32        (positional-encoding tile)
        # out_ref : VMEM [1, TS, E] f32
        # gbuf    : VMEM [TS, E] f32        (gathered embedding rows)
        # sem     : DMA semaphore (1,)
        t = pl.program_id(0)
        b = pl.program_id(1)
        base = b * seq_len + t * seq_tile  # flat index of first token in tile

        # Issue one row DMA per token; all TS copies are outstanding at once.
        @pl.loop(0, seq_tile)
        def _issue(i):
            tok = ids_ref[base + i]
            pltpu.make_async_copy(emb_hbm.at[tok], gbuf.at[i], sem.at[0]).start()

        # Wait for all row copies (wait descriptors only need matching shapes).
        @pl.loop(0, seq_tile)
        def _wait(i):
            pltpu.make_async_copy(emb_hbm.at[0], gbuf.at[0], sem.at[0]).wait()

        # Single vectorized PE add + tile store.
        out_ref[0] = gbuf[...] + pe_ref[...]

    return kernel


def position_embedding(x_ids: jnp.ndarray,
                       emb_table: jnp.ndarray,
                       pe: jnp.ndarray,
                       *, seq_tile: int | None = None) -> jnp.ndarray:
    """x_ids: [B, S] int; emb_table: [V, E] f32; pe: [S, E] f32 -> [B, S, E] f32."""
    B, S = x_ids.shape
    V, E = emb_table.shape
    assert pe.shape == (S, E), "forward assumes seq_len == max_len (as in PyTorch)"

    # No per-call padding; casts are no-ops when callers pass f32 (hoisted work).
    if emb_table.dtype != jnp.float32:
        emb_table = emb_table.astype(jnp.float32)
    if pe.dtype != jnp.float32:
        pe = pe.astype(jnp.float32)

    TS = seq_tile if seq_tile is not None else _pick_seq_tile(S, B)
    assert S % TS == 0

    ids_flat = x_ids.astype(jnp.int32).reshape(B * S)   # 1-D SMEM (minimal padding)

    # Per-step VMEM: gather buf (1x) + PE tile (2x, double-buffered) + out tile (2x).
    tile_bytes = TS * E * 4
    vmem_limit = int(min(48 << 20, max(8 << 20, 4 * 5 * tile_bytes)))

    grid = (S // TS, B)   # batch innermost -> PE tile (keyed on t only) stays resident

    out = pl.pallas_call(
        _make_kernel(S, TS),
        out_shape=jax.ShapeDtypeStruct((B, S, E), jnp.float32),
        grid_spec=pltpu.PrefetchScalarGridSpec(
            num_scalar_prefetch=1,
            grid=grid,
            in_specs=[
                pl.BlockSpec(memory_space=pl.ANY),                  # table stays in HBM
                pl.BlockSpec((TS, E), lambda t, b, ids: (t, 0)),    # PE tile
            ],
            out_specs=pl.BlockSpec((1, TS, E), lambda t, b, ids: (b, t, 0)),
            scratch_shapes=[
                pltpu.VMEM((TS, E), jnp.float32),     # gathered rows
                pltpu.SemaphoreType.DMA((1,)),        # shared by the row copies
            ],
        ),
        compiler_params=pltpu.CompilerParams(
            dimension_semantics=("parallel", "parallel"),
            vmem_limit_bytes=vmem_limit,
        ),
    )(ids_flat, emb_table, pe)
    return out


if __name__ == "__main__":
    # Small shapes consistent with the module: batch=2, max_len(seq)=8,
    # emb_dim=32, n_vocab=16.
    B, S, E, V = 2, 8, 32, 16

    key = jax.random.PRNGKey(0)
    k_emb, k_ids = jax.random.split(key)

    # nn.Embedding(n_vocab, emb_dim) with weight ~ N(0, 0.1); PE built once (f32).
    emb_table = (0.1 * jax.random.normal(k_emb, (V, E))).astype(jnp.float32)
    pe = _make_sinusoid_pe(S, E)  # forward assumes seq_len == max_len

    x_ids = jax.random.randint(k_ids, (B, S), 0, V, dtype=jnp.int32)

    out = position_embedding(x_ids, emb_table, pe)
    out = jax.block_until_ready(out)

    # Pure-JAX reference: embeddings(x) + pe  (pe broadcasts over batch)
    ref = emb_table[x_ids] + pe[None, :, :]
    np.testing.assert_allclose(np.asarray(out), np.asarray(ref), rtol=1e-6, atol=1e-6)

    print("KERNEL_OK")
</pallas_src>

<mosaic_0001>
module attributes {stable_mosaic.version = 11 : i64} {
  func.func @kernel(%arg0: i32, %arg1: i32, %arg2: memref<16xi32, #tpu.memory_space<smem>>, %arg3: memref<16x32xf32, #tpu.memory_space<any>>, %arg4: memref<8x32xf32, #tpu.memory_space<vmem>>, %arg5: memref<1x8x32xf32, #tpu.memory_space<vmem>>, %arg6: memref<8x32xf32, #tpu.memory_space<vmem>>, %arg7: memref<1x!tpu.dma_semaphore, #tpu.memory_space<semaphore_mem>>) attributes {dimension_semantics = [#tpu.dimension_semantics<parallel>, #tpu.dimension_semantics<parallel>], iteration_bounds = array<i64: 1, 2>, scalar_prefetch = 1 : i64, scratch_operands = 2 : i64, tpu.core_type = #tpu.core_type<tc>, window_params = [{}, {transform_indices = @transform_1, window_bounds = array<i64: 8, 32>}, {transform_indices = @transform_2, window_bounds = array<i64: 1, 8, 32>}]} {
    %c8_i32 = arith.constant 8 : i32
    %0 = arith.muli %arg1, %c8_i32 : i32
    %c8_i32_0 = arith.constant 8 : i32
    %1 = arith.muli %arg0, %c8_i32_0 : i32
    %2 = arith.addi %0, %1 : i32
    %c0_i32 = arith.constant 0 : i32
    %c8_i32_1 = arith.constant 8 : i32
    %3 = arith.addi %c0_i32, %c8_i32_1 : i32
    %c1_i32 = arith.constant 1 : i32
    scf.for %arg8 = %c0_i32 to %3 step %c1_i32  : i32 {
      %c1_i32_12 = arith.constant 1 : i32
      %11 = arith.muli %arg8, %c1_i32_12 : i32
      %c0_i32_13 = arith.constant 0 : i32
      %12 = arith.addi %c0_i32_13, %11 : i32
      %13 = arith.addi %2, %12 : i32
      %14 = arith.index_cast %13 : i32 to index
      %15 = memref.load %arg2[%14] : memref<16xi32, #tpu.memory_space<smem>>
      %c0_i32_14 = arith.constant 0 : i32
      %c0_i32_15 = arith.constant 0 : i32
      %16 = tpu.memref_slice %arg3[%15, %c0_i32_15] : memref<16x32xf32, #tpu.memory_space<any>> -> memref<1x32xf32, #tpu.memory_space<any>>
      %17 = tpu.memref_squeeze %16 : memref<1x32xf32, #tpu.memory_space<any>> -> memref<32xf32, #tpu.memory_space<any>>
      %c0_i32_16 = arith.constant 0 : i32
      %18 = tpu.memref_slice %arg6[%12, %c0_i32_16] : memref<8x32xf32, #tpu.memory_space<vmem>> -> memref<1x32xf32, #tpu.memory_space<vmem>>
      %19 = tpu.memref_squeeze %18 : memref<1x32xf32, #tpu.memory_space<vmem>> -> memref<32xf32, #tpu.memory_space<vmem>>
      %20 = tpu.memref_slice %arg7[%c0_i32_14] : memref<1x!tpu.dma_semaphore, #tpu.memory_space<semaphore_mem>> -> memref<1x!tpu.dma_semaphore, #tpu.memory_space<semaphore_mem>>
      %21 = tpu.memref_squeeze %20 : memref<1x!tpu.dma_semaphore, #tpu.memory_space<semaphore_mem>> -> memref<!tpu.dma_semaphore, #tpu.memory_space<semaphore_mem>>
      tpu.enqueue_dma source(%17 : memref<32xf32, #tpu.memory_space<any>>) target(%19 : memref<32xf32, #tpu.memory_space<vmem>>) target_semaphore(%21 : memref<!tpu.dma_semaphore, #tpu.memory_space<semaphore_mem>>)
    }
    %c8_i32_2 = arith.constant 8 : i32
    %c0_i32_3 = arith.constant 0 : i32
    %c8_i32_4 = arith.constant 8 : i32
    %4 = arith.addi %c0_i32_3, %c8_i32_4 : i32
    %c1_i32_5 = arith.constant 1 : i32
    scf.for %arg8 = %c0_i32_3 to %4 step %c1_i32_5  : i32 {
      %c0_i32_12 = arith.constant 0 : i32
      %c0_i32_13 = arith.constant 0 : i32
      %c0_i32_14 = arith.constant 0 : i32
      %c0_i32_15 = arith.constant 0 : i32
      %11 = tpu.memref_slice %arg3[%c0_i32_12, %c0_i32_15] : memref<16x32xf32, #tpu.memory_space<any>> -> memref<1x32xf32, #tpu.memory_space<any>>
      %12 = tpu.memref_squeeze %11 : memref<1x32xf32, #tpu.memory_space<any>> -> memref<32xf32, #tpu.memory_space<any>>
      %c0_i32_16 = arith.constant 0 : i32
      %13 = tpu.memref_slice %arg6[%c0_i32_13, %c0_i32_16] : memref<8x32xf32, #tpu.memory_space<vmem>> -> memref<1x32xf32, #tpu.memory_space<vmem>>
      %14 = tpu.memref_squeeze %13 : memref<1x32xf32, #tpu.memory_space<vmem>> -> memref<32xf32, #tpu.memory_space<vmem>>
      %15 = tpu.memref_slice %arg7[%c0_i32_14] : memref<1x!tpu.dma_semaphore, #tpu.memory_space<semaphore_mem>> -> memref<1x!tpu.dma_semaphore, #tpu.memory_space<semaphore_mem>>
      %16 = tpu.memref_squeeze %15 : memref<1x!tpu.dma_semaphore, #tpu.memory_space<semaphore_mem>> -> memref<!tpu.dma_semaphore, #tpu.memory_space<semaphore_mem>>
      tpu.wait_dma2 semaphore(%16 : memref<!tpu.dma_semaphore, #tpu.memory_space<semaphore_mem>>) src(%12 : memref<32xf32, #tpu.memory_space<any>>) dst(%14 : memref<32xf32, #tpu.memory_space<vmem>>)
    }
    %c0 = arith.constant 0 : index
    %c0_6 = arith.constant 0 : index
    %5 = vector.load %arg6[%c0, %c0_6] : memref<8x32xf32, #tpu.memory_space<vmem>>, vector<8x32xf32>
    %c0_7 = arith.constant 0 : index
    %c0_8 = arith.constant 0 : index
    %6 = vector.load %arg4[%c0_7, %c0_8] : memref<8x32xf32, #tpu.memory_space<vmem>>, vector<8x32xf32>
    %7 = arith.addf %5, %6 : vector<8x32xf32>
    %c0_9 = arith.constant 0 : index
    %c0_10 = arith.constant 0 : index
    %c0_11 = arith.constant 0 : index
    %8 = vector.load %arg5[%c0_9, %c0_10, %c0_11] : memref<1x8x32xf32, #tpu.memory_space<vmem>>, vector<1x8x32xf32>
    %9 = vector.shape_cast %8 : vector<1x8x32xf32> to vector<8x32xf32>
    %10 = vector.shape_cast %7 : vector<8x32xf32> to vector<1x8x32xf32>
    tpu.vector_store %arg5[%c0_9, %c0_10, %c0_11], %10 {strides = array<i32>} : memref<1x8x32xf32, #tpu.memory_space<vmem>>, vector<1x8x32xf32>,
    return
  }
  func.func @transform_1(%arg0: i32, %arg1: i32, %arg2: memref<16xi32, #tpu.memory_space<smem>>) -> (i32, i32) {
    %c0_i32 = arith.constant 0 : i32
    %c0_i32_0 = arith.constant 0 : i32
    return %arg0, %c0_i32 : i32, i32
  }
  func.func @transform_2(%arg0: i32, %arg1: i32, %arg2: memref<16xi32, #tpu.memory_space<smem>>) -> (i32, i32, i32) {
    %c0_i32 = arith.constant 0 : i32
    %c0_i32_0 = arith.constant 0 : i32
    return %arg1, %arg0, %c0_i32 : i32, i32, i32
  }
}

</mosaic_0001>

<bundles_post_ra>
// kernel: tpu_custom_call.1
= control target key start
LH: loop header
LB: loop body
LE: loop exit
PB: predicated region body
PF: predicated region fallthrough
CT: control target
= control target key end

     0   :  { %s754_s0 = inlined_call_operand.hbm [shape: s32[16], index: 0, kind: input, shape index: {}]   ;;  %s755_s1 = inlined_call_operand.hbm [shape: f32[16,32], index: 1, kind: input, shape index: {}]   ;;  %s756_s2 = inlined_call_operand.hbm [shape: f32[8,32], index: 2, kind: input, shape index: {}]   ;;  %s757_s3 = inlined_call_operand.hbm [shape: f32[2,8,32], index: 3, kind: output, shape index: {}]  }
   0x1   :  { %s374_s14 = scalar_lea.hbm %s754_s0, 16 }
   0x2   :  { %p375_p0 = scmp.ne.s32.totalorder %s754_s0, %s374_s14  ;;  %p378_p1 = scmp.lt.u32.totalorder %s374_s14, %s754_s0 }
   0x4   :  { %p380_p2 = pnand %p378_p1, %p375_p0 }
   0x6   :  { %383 = shalt.err (!%p380_p2)  }
   0x7   :  { %s540_s19 = smov [#allocation5]  }
   0x8   :  { %9 = dma.hbm_to_smem %s754_s0, 16, %s540_s19, [#allocation4] }
   0x9   :  { %496 = dma.done.wait [#allocation4], 16 }
   0xa   :  { %497 = vsyncadd [#allocation4], 4294967280 }
   0xb   :  { %11 = sfence }
   0xc   :  { %12 = vsyncpa [#allocation7], 0 }
   0xd   :  { %13 = vsyncpa [#allocation8], 0 }
   0xe   :  { %15 = vsyncpa [#allocation8 + $0x1], 0  ;;  %s576_s22 = smov 0   ;;  %s578_s23 = smov 0  }
   0xf   :  { %s580_s24 = smov 0   ;;  %s582_s25 = smov 0  }
  0x10   :  { %s584_s26 = smov 0   ;;  %s586_s27 = smov 0  }
  0x11 LB: > { %s277_s0 = sadd.s32 4294967295, %s530_s27   ;;  %s278_s28 = sadd.s32 4294967294, %s530_s27   ;;  %s530_s27 = sphi %s586_s27, %s21_s27   ;;  %s526_s26 = sphi %s584_s26, %s777_s26   ;;  %s522_s25 = sphi %s582_s25, %s776_s25   ;;  %s518_s24 = sphi %s580_s24, %s775_s24   ;;  %s514_s23 = sphi %s578_s23, %s774_s23   ;;  %s510_s22 = sphi %s576_s22, %s773_s22  }
  0x12   : > { %s30_s29 = sadd.s32 1, %s526_s26  ;;  %s68_s30 = sadd.s32 1, %s518_s24 }
  0x13   : > { %p31_p3 = scmp.ge.s32.totalorder %s30_s29, 2  ;;  %p78_p4 = scmp.ne.s32.totalorder %s518_s24, %s514_s23 }
  0x14   : > { %p79_p5 = scmp.eq.s32.totalorder %s277_s0, 1  ;;  %p84_p6 = scmp.ne.s32.totalorder %s514_s23, %s510_s22 }
  0x15   : > { %s779_s29 = smov (%p31_p3, %s30_s29), 0  ;;  %p85_p8 = scmp.eq.s32.totalorder %s278_s28, 1 }
  0x16   : > { %p616_p7 = por %p79_p5, %p78_p4  ;;  %s63_s5 = ssub.s32 %s526_s26, %s779_s29 }
  0x17   : > { %p279_p9 = scmp.ge.s32.totalorder %s530_s27, 1  ;;  %p66_p10 = scmp.eq.s32.totalorder %s63_s5, 0 }
  0x18   : > { %s763_s4 = scalar_select %p616_p7, 1, 0 }
  0x19   : > { %p623_p11 = por %p85_p8, %p84_p6  ;;  %p92_p12 = scmp.lt.s32.totalorder %s530_s27, 3 }
  0x1a   : > { %s629_s7 = scalar_select %p66_p10, %s518_s24, %s68_s30  }
  0x1b   : > { %s764_s6 = scalar_select %p623_p11, 1, 0 }
  0x1c   : > { %p631_p13 = pnand %p279_p9, %p92_p12  ;;  %p635_p0 = scmp.eq.s32.totalorder %s277_s0, 0 }
  0x1d   : > { %s541_s10 = smov [#allocation6]   ;;  %s384_s15 = scalar_lea.hbm %s756_s2, 128 }
  0x1e   : > { %s765_s8 = scalar_select %p631_p13, 1, 0 }
  0x1f   : > { %s766_s9 = scalar_select %p635_p0, 1, 0 }
  0x20   : > { %p297_p1 = pneg %p631_p13  ;;  %s107_s11 = sshll.u32 %s541_s10, 4  ;;  %s108_s11 = int_to_ptr.vmem [resolvable:$true] %s107_s11 }
  0x21   : > { %p385_p3 = scmp.ne.s32.totalorder %s756_s2, %s384_s15  ;;  %p391_p8 = scmp.lt.u32.totalorder %s384_s15, %s756_s2 }
  0x22   : > { %p643_p2 = pnand %p635_p0, %p297_p1 }
  0x24   : > { %p386_p4 = pneg %p643_p2 }
  0x26   : > { %p387_p5 = pnand %p386_p4, %p385_p3 }
  0x28   : > { %p388_p6 = pneg %p387_p5 }
  0x2a   : > { %p393_p9 = pnand %p391_p8, %p388_p6 }
  0x2c   : > { %396 = shalt.err (!%p393_p9)
}
  0x2d   : > { %s397_s20 = scalar_lea.vmem %s108_s11, 128  ;;  %p405_p11 = scmp.lt.s32.totalorder %s108_s11, %s108_s11 }
  0x2e   : > { %p398_p10 = scmp.ne.s32.totalorder %s108_s11, %s397_s20  ;;  %p406_p7 = scmp.lt.s32.totalorder %s397_s20, %s397_s20 }
  0x30   : > { %p400_p12 = pnand %p398_p10, %p386_p4  ;;  %p407_p0 = por %p406_p7, %p405_p11 }
  0x32   : > { %p401_p1 = pneg %p400_p12 }
  0x34   : > { %p408_p13 = pnand %p407_p0, %p401_p1 }
  0x36   : > { %411 = shalt.err (!%p408_p13)
}
  0x37   : > { %300 = dma.hbm_to_vmem [thread:$0]  (!%p643_p2), %s756_s2, 128, %s108_s11, [#allocation7]  }
  0x38   : > { %p768_p3 = scmp.ne.s32.totalorder %s765_s8, 0 }
  0x39   : > { %p769_p5 = scmp.ne.s32.totalorder (!%p768_p3), %s766_s9, 0 }
  0x3a   : > { %120 = sbr.rel (%p768_p3) target bundleno = 138 (0x8a), region = 24 }
  0x41   : > { %499 = dma.done.wait (%p769_p5), [#allocation7], 128  }
  0x42   : > { %501 = vsyncadd (%p769_p5), [#allocation7], 4294967168  ;;  %s762_s28 = sand.u32 1, %s514_s23   ;;  %s284_s30 = sshll.u32 %s522_s25, 3 }
  0x43   : > { %s673_s5 = sshll.u32 %s762_s28, 3  ;;  %s676_s11 = smov 0  }
  0x44   : > { %s134_s10 = scalar_lea.vmem [#allocation9], %s673_s5 }
  0x45 LB: >> { %s144_s8 = sadd.s32 %s534_s11, %s284_s30  ;;  %s148_s12 = scalar_lea.vmem [#allocation2], %s534_s11  ;;  %s534_s11 = sphi %s676_s11, %s143_s11  }
  0x46   : >> { %s145_s9 = sld [smem:[#allocation5 + %s144_s8]]  ;;  %s156_s13 = sshll.u32 %s148_s12, 4  ;;  %s157_s13 = int_to_ptr.vmem [resolvable:$true] %s156_s13 }
  0x47   : >> { %s414_s21 = scalar_lea.hbm %s755_s1, 256 }
  0x4c   : >> { %s285_s14 = sshll.u32 %s145_s9, 4 }
  0x4d   : >> { %s147_s17 = scalar_lea.hbm %s755_s1, %s285_s14 }
  0x4e   : >> { %s412_s18 = scalar_lea.hbm %s147_s17, 16  ;;  %p415_p11 = scmp.lt.u32.totalorder %s147_s17, %s755_s1 }
  0x4f   : >> { %p413_p7 = scmp.ne.s32.totalorder %s147_s17, %s412_s18  ;;  %p416_p13 = scmp.lt.u32.totalorder %s414_s21, %s412_s18 }
  0x50   : >> { %p418_p2 = scmp.lt.u32.totalorder %s412_s18, %s147_s17 }
  0x51   : >> { %p417_p0 = por %p416_p13, %p415_p11 }
  0x53   : >> { %p419_p4 = por %p418_p2, %p417_p0 }
  0x55   : >> { %p420_p6 = pnand %p419_p4, %p413_p7 }
  0x57   : >> { %423 = shalt.err (!%p420_p6)  }
  0x58   : >> { %s424_s8 = scalar_lea.vmem %s157_s13, 16  ;;  %s542_s9 = smov [#allocation2]  }
  0x59   : >> { %p425_p8 = scmp.ne.s32.totalorder %s157_s13, %s424_s8  ;;  %s426_s12 = sshll.u32 %s542_s9, 4  ;;  %s427_s12 = int_to_ptr.vmem [resolvable:$false] %s426_s12 }
  0x5a   : >> { %s428_s14 = scalar_lea.vmem %s427_s12, 128  ;;  %p429_p9 = scmp.lt.s32.totalorder %s157_s13, %s427_s12 }
  0x5b   : >> { %p430_p10 = scmp.lt.s32.totalorder %s428_s14, %s424_s8 }
  0x5d   : >> { %p431_p12 = por %p430_p10, %p429_p9 }
  0x5f   : >> { %p432_p1 = pnand %p431_p12, %p425_p8 }
  0x61   : >> { %435 = shalt.err (!%p432_p1)  }
  0x62   : >> { %159 = dma.hbm_to_vmem [thread:$0]  %s147_s17, 16, %s157_s13, [#allocation3] }
  0x63   : >> { %s143_s11 = sadd.s32 1, %s534_s11  }
  0x64   : >> { %p140_p3 = scmp.ge.s32.totalorder %s143_s11, 8  }
  0x65   : > { %s536_s28 = smov (%p140_p3), 0  }
  0x66   : > { %142 = sbr.rel (!%p140_p3) target bundleno = 69 (0x45), region = 82 }
  0x6d LB: >> { %502 = dma.done.wait [#allocation3], 16  ;;  %s538_s28 = sphi %s536_s28, %s165_s28  }
  0x6e   : >> { %503 = vsyncadd [#allocation3], 4294967280  ;;  %s165_s28 = sadd.s32 1, %s538_s28  }
  0x6f   : >> { %p162_p5 = scmp.ge.s32.totalorder %s165_s28, 8  }
  0x70   : > { %v168_v0 = vld [vmem:[#allocation2] sm:$0xff] (%p162_p5)  ;;  %v169_v1 = vld [vmem:[#allocation6] sm:$0xff] (%p162_p5)  ;;  %vm171_vm0 = vcmask (%p162_p5), 261120   ;;  %s287_s11 = sshll.u32 (%p162_p5), %s522_s25, 7  ;;  %s188_s16 = sshll.u32 (%p162_p5), %s134_s10, 4  ;;  %s705_s16 = int_to_ptr.vmem [resolvable:$true] %s188_s16 }
  0x71   : > { %164 = sbr.rel (!%p162_p5) target bundleno = 109 (0x6d), region = 93  ;;  %v170_v2 = vadd.f32 (%p162_p5), %v169_v1, %v168_v0  ;;  %s701_s15 = scalar_lea.hbm (%p162_p5), %s757_s3, %s287_s11 }
  0x72   : > { %s770_s17 = sand.u32 (%p162_p5), 1, %s514_s23   ;;  %s436_s19 = scalar_lea.vmem (%p162_p5), %s705_s16, 128 }
  0x73   : > { %172 = vst.msk [vmem:[%s134_s10] sm:$0xff] (%p162_p5), %vm171_vm0, %v170_v2  ;;  %s174_s18 = scalar_lea.sflag (%p162_p5), [#allocation8], %s770_s17  ;;  %p437_p7 = scmp.ne.s32.totalorder (%p162_p5), %s705_s16, %s436_s19 }
  0x74   : > { %p771_p11 = scmp.ne.s32.totalorder (%p162_p5), %s763_s4, 0  ;;  %s543_s25 = smov (%p162_p5), [#allocation9]  }
  0x75   : > { %s440_s20 = sshll.u32 (%p162_p5), %s543_s25, 4  ;;  %s441_s20 = int_to_ptr.vmem [resolvable:$false] %s440_s20 }
  0x76   : > { %p438_p13 = pnand (%p162_p5), %p437_p7, %p771_p11  ;;  %s442_s21 = scalar_lea.vmem (%p162_p5), %s441_s20, 256 }
  0x77   : > { %p443_p2 = scmp.lt.s32.totalorder (%p162_p5), %s705_s16, %s441_s20  ;;  %p444_p4 = scmp.lt.s32.totalorder (%p162_p5), %s442_s21, %s436_s19 }
  0x78   : > { %p439_p0 = pneg %p438_p13 }
  0x79   : > { %p445_p6 = por %p444_p4, %p443_p2 }
  0x7b   : > { %p446_p8 = pnand %p445_p6, %p439_p0 }
  0x7d   : > { %449 = shalt.err (!%p446_p8)
}
  0x7e   : > { %s450_s5 = scalar_lea.hbm %s701_s15, 128  ;;  %s454_s8 = scalar_lea.hbm %s757_s3, 256 }
  0x7f   : > { %p451_p9 = scmp.ne.s32.totalorder %s701_s15, %s450_s5  ;;  %p455_p1 = scmp.lt.u32.totalorder %s701_s15, %s757_s3 }
  0x80   : > { %p456_p3 = scmp.lt.u32.totalorder %s454_s8, %s450_s5  ;;  %p458_p7 = scmp.lt.u32.totalorder %s450_s5, %s701_s15 }
  0x81   : > { %p452_p10 = pnand %p451_p9, %p771_p11 }
  0x82   : > { %p457_p5 = por %p456_p3, %p455_p1 }
  0x83   : > { %p453_p12 = pneg %p452_p10 }
  0x84   : > { %p459_p13 = por %p458_p7, %p457_p5 }
  0x86   : > { %p460_p0 = pnand %p459_p13, %p453_p12 }
  0x88   : > { %463 = shalt.err (!%p460_p0)
}
  0x89   : > { %295 = dma.vmem_to_hbm [thread:$0]  (%p771_p11), %s705_s16, 128, %s701_s15, %s174_s18  }
  0x8a PF: > { %p307_p2 = scmp.ge.s32.totalorder %s530_s27, 2  ;;  %s200_s14 = sand.u32 1, %s510_s22  }
  0x8b   : > { %p772_p4 = scmp.ne.s32.totalorder %s764_s6, 0  ;;  %s201_s28 = scalar_lea.sflag [#allocation8], %s200_s14 }
  0x8d   : > { %p302_p6 = pnand %p307_p2, %p772_p4 }
  0x8f   : > { %505 = dma.done.wait (!%p302_p6), %s201_s28, 128  }
  0x90   : > { %507 = vsyncadd (!%p302_p6), %s201_s28, 4294967168  ;;  %s21_s27 = sadd.s32 1, %s530_s27   ;;  %s773_s22 = smov %s514_s23 }
  0x91   : > { %p18_p8 = scmp.ge.s32.totalorder %s21_s27, 4   ;;  %s774_s23 = smov %s518_s24 }
  0x92   : > { %s775_s24 = smov %s629_s7  ;;  %s776_s25 = smov %s526_s26 }
  0x93   : > { %s777_s26 = smov %s779_s29  ;;  %20 = sbr.rel (!%p18_p8) target bundleno = 17 (0x11), region = 104 }
  0x9a   :  { %206 = vsyncpa [#allocation7], 1 }
  0x9b   :  { %208 = vsyncpa [#allocation7 + $0x1], 1 }
  0x9c   :  { %209 = vsyncpa [#allocation8], 1 }
  0x9d   :  { %211 = vsyncpa [#allocation8 + $0x1], 1 }
  0x9e   :  { %212 = vsyncmov [#allocation3] }
  0xa1   :  { %s213_s4 = vpop.sfrf %212 }
  0xa2   :  { %p290_p11 = scmp.ne.s32.totalorder %s213_s4, 0 }
  0xa4   :  { %217 = shalt.err (%p290_p11)  }

</bundles_post_ra>
